<compile_context>
chip_gen: v6e
topology: v6e:2x2x1
jax: 0.10.0
libtpu: 0.0.40
codegen_flags: <defaults>
</compile_context>

<pallas_src>
import numpy as np
import jax
import jax.numpy as jnp
from jax.experimental import pallas as pl
from jax.experimental.pallas import tpu as pltpu


def _round_up(n: int, m: int) -> int:
    return ((n + m - 1) // m) * m


def _sublane_multiple(dtype) -> int:
    bits = np.dtype(dtype).itemsize * 8
    if bits >= 32:
        return 8
    if bits == 16:
        return 16
    return 32


def _vmem_capacity_bytes() -> int:
    try:
        return int(pltpu.get_tpu_info().vmem_capacity_bytes)
    except Exception:
        return 64 << 20   # conservative default: v7x per-TensorCore VMEM


def _mlp_kernel(x_ref, w1_ref, w2_ref, w3_ref, bh_ref, b3_ref, o_ref):
    # Cast the activation tile to the MXU operand dtype in VMEM (cheap VPU op)
    # so x streams from HBM unpadded and in its original dtype.
    x = x_ref[...].astype(w1_ref.dtype)
    # Layer 1: Linear(state_dim -> hidden) + ReLU. f32 MXU accumulation.
    h1 = jnp.dot(x, w1_ref[...], preferred_element_type=jnp.float32)
    h1 = jnp.maximum(h1 + bh_ref[0:1, :], 0.0)      # bias/ReLU in f32 (v5e-safe)
    # Layer 2: Linear(hidden -> hidden) + ReLU.
    h2 = jnp.dot(h1.astype(w2_ref.dtype), w2_ref[...],
                 preferred_element_type=jnp.float32)
    h2 = jnp.maximum(h2 + bh_ref[1:2, :], 0.0)
    # Layer 3: Linear(hidden -> action_dim), logits (no activation).
    out = jnp.dot(h2.astype(w3_ref.dtype), w3_ref[...],
                  preferred_element_type=jnp.float32) + b3_ref[...]
    o_ref[...] = out.astype(o_ref.dtype)


def prepare_params(params, *, mxu_dtype=None):
    """One-time conversion of BehaviorCloningNet params for the Pallas kernel.

    params = (w1, b1, w2, b2, w3, b3) with w_i as [in, out] (transposed vs
    torch), b_i as [out] or [1, out]. Only the hidden dim is zero-padded to a
    multiple of 128 lanes, and it is done HERE (hoisted out of the per-call
    path). state_dim / action_dim stay unpadded.
    """
    w1, b1, w2, b2, w3, b3 = params
    S, H = w1.shape
    A = w3.shape[1]
    if mxu_dtype is None:
        mxu_dtype = w1.dtype
    H_p = _round_up(H, 128)

    w1p = jnp.zeros((S, H_p), mxu_dtype).at[:, :H].set(w1.astype(mxu_dtype))
    w2p = jnp.zeros((H_p, H_p), mxu_dtype).at[:H, :H].set(w2.astype(mxu_dtype))
    w3p = jnp.zeros((H_p, A), mxu_dtype).at[:H, :].set(w3.astype(mxu_dtype))
    # Biases stay f32 (bias-add / ReLU run on the VPU in f32). b1/b2 are packed
    # into one (2, H_p) array to cut per-step BlockSpec/DMA bookkeeping.
    bh = jnp.zeros((2, H_p), jnp.float32)
    bh = bh.at[0, :H].set(jnp.reshape(b1, (-1,)).astype(jnp.float32))
    bh = bh.at[1, :H].set(jnp.reshape(b2, (-1,)).astype(jnp.float32))
    b3p = jnp.reshape(b3, (1, A)).astype(jnp.float32)

    return dict(w1=w1p, w2=w2p, w3=w3p, bh=bh, b3=b3p,
                state_dim=S, hidden=H, hidden_padded=H_p, action_dim=A,
                mxu_dtype=np.dtype(mxu_dtype))


def behavior_cloning_forward(x, prepared, *, batch_tile=None):
    """Fused Pallas TPU forward for BehaviorCloningNet (3-layer MLP)."""
    w1p, w2p, w3p = prepared["w1"], prepared["w2"], prepared["w3"]
    bh, b3p = prepared["bh"], prepared["b3"]
    S, H = prepared["state_dim"], prepared["hidden"]
    H_p, A = prepared["hidden_padded"], prepared["action_dim"]
    mxu_dtype = prepared["mxu_dtype"]

    B, Sx = x.shape
    assert Sx == S, f"state_dim mismatch: {Sx} vs {S}"
    out_dtype = x.dtype

    # --- batch tile: >=2 grid steps when possible (so the "parallel" axis can
    # shard across v7x's two TensorCores) and up to 1024 rows (amortizes the
    # ~0.35us/step overhead; feature dims are small so VMEM is not a concern).
    sub = max(_sublane_multiple(x.dtype), _sublane_multiple(mxu_dtype))
    if batch_tile is None:
        batch_tile = min(1024, _round_up(pl.cdiv(B, 2), sub))
    batch_tile = max(sub, _round_up(min(batch_tile, _round_up(B, sub)), sub))
    B_p = _round_up(B, batch_tile)
    grid = (B_p // batch_tile,)

    # Only the batch dim is ever padded, and only when B % batch_tile != 0.
    xp = x if B_p == B else jnp.zeros((B_p, S), x.dtype).at[:B].set(x)

    # --- VMEM budget: single-buffered resident weights (constant index_map,
    # pl.Buffered(1)) + double-buffered x/out tiles + f32 intermediates;
    # clamped to 85% of this generation's physical VMEM (64 MiB on v7x).
    wb = np.dtype(mxu_dtype).itemsize
    xb = np.dtype(x.dtype).itemsize
    ob = np.dtype(out_dtype).itemsize
    weight_bytes = (S * H_p + H_p * H_p + H_p * A) * wb + (2 * H_p + A) * 4
    io_bytes = 2 * batch_tile * (S * xb + A * ob)        # x/out, double-buffered
    act_bytes = 2 * batch_tile * H_p * 4                 # h1, h2 in f32
    budget = weight_bytes + io_bytes + act_bytes + (4 << 20)
    vmem_cap = int(0.85 * _vmem_capacity_bytes())
    vmem_limit = int(min(max(budget, 32 << 20), vmem_cap))

    # Cost estimate from the true (unpadded) problem size.
    cost = pl.CostEstimate(
        flops=2 * B * (S * H + H * H + H * A),
        transcendentals=0,
        bytes_accessed=(B * S * xb + (S * H + H * H + H * A) * wb
                        + (2 * H + A) * 4 + B * A * ob),
    )

    resident = pl.Buffered(1)   # constant-index blocks: fetch once, single buffer
    out = pl.pallas_call(
        _mlp_kernel,
        out_shape=jax.ShapeDtypeStruct((B_p, A), out_dtype),
        grid_spec=pltpu.PrefetchScalarGridSpec(
            num_scalar_prefetch=0,
            grid=grid,
            in_specs=[
                pl.BlockSpec((batch_tile, S), lambda i: (i, 0)),   # x tile, unpadded lanes
                pl.BlockSpec((S, H_p), lambda i: (0, 0), pipeline_mode=resident),    # W1
                pl.BlockSpec((H_p, H_p), lambda i: (0, 0), pipeline_mode=resident),  # W2
                pl.BlockSpec((H_p, A), lambda i: (0, 0), pipeline_mode=resident),    # W3
                pl.BlockSpec((2, H_p), lambda i: (0, 0), pipeline_mode=resident),    # b1|b2
                pl.BlockSpec((1, A), lambda i: (0, 0), pipeline_mode=resident),      # b3
            ],
            out_specs=pl.BlockSpec((batch_tile, A), lambda i: (i, 0)),
        ),
        compiler_params=pltpu.CompilerParams(
            dimension_semantics=("parallel",),   # batch tiles shard across TCs on v7x
            vmem_limit_bytes=vmem_limit,
        ),
        cost_estimate=cost,
    )(xp, w1p, w2p, w3p, bh, b3p)

    return out if B_p == B else out[:B]


def init_params(key, state_dim, action_dim, hidden_size, dtype=jnp.float32):
    """Deterministic init mirroring torch.nn.Linear's U(-1/sqrt(fan_in), ...)."""
    def linear(k, fan_in, fan_out):
        kw, kb = jax.random.split(k)
        bound = 1.0 / jnp.sqrt(fan_in)
        w = jax.random.uniform(kw, (fan_in, fan_out), dtype, -bound, bound)
        b = jax.random.uniform(kb, (1, fan_out), dtype, -bound, bound)
        return w, b

    k1, k2, k3 = jax.random.split(key, 3)
    w1, b1 = linear(k1, state_dim, hidden_size)
    w2, b2 = linear(k2, hidden_size, hidden_size)
    w3, b3 = linear(k3, hidden_size, action_dim)
    return (w1, b1, w2, b2, w3, b3)


def _reference_forward(x, params):
    w1, b1, w2, b2, w3, b3 = params
    h1 = jnp.maximum(x @ w1 + b1, 0.0)
    h2 = jnp.maximum(h1 @ w2 + b2, 0.0)
    return h2 @ w3 + b3


if __name__ == "__main__":
    # Small shapes consistent with the module's forward.
    state_dim, action_dim, hidden_size = 16, 8, 32

    key = jax.random.PRNGKey(0)
    kx, kp, kx2 = jax.random.split(key, 3)
    params = init_params(kp, state_dim, action_dim, hidden_size)

    # One-time param prep (padding/casting hoisted out of the per-call path).
    prep_f32 = prepare_params(params)                        # f32 MXU operands
    prep_bf16 = prepare_params(params, mxu_dtype=jnp.bfloat16)

    # 1) f32 path, small batch (single grid step).
    x = jax.random.normal(kx, (8, state_dim), dtype=jnp.float32)
    out = jax.block_until_ready(behavior_cloning_forward(x, prep_f32))
    ref = _reference_forward(x, params)
    assert out.shape == (8, action_dim)
    # Tolerance covers MXU default-precision differences vs the XLA reference.
    assert jnp.allclose(out, ref, atol=2e-2, rtol=2e-2), "f32 mismatch vs reference"

    # 2) f32 path, multi-step grid (batch_tile=16 -> 4 pipelined steps).
    x2 = jax.random.normal(kx2, (64, state_dim), dtype=jnp.float32)
    out2 = jax.block_until_ready(
        behavior_cloning_forward(x2, prep_f32, batch_tile=16))
    ref2 = _reference_forward(x2, params)
    assert out2.shape == (64, action_dim)
    assert jnp.allclose(out2, ref2, atol=2e-2, rtol=2e-2), "f32 tiled mismatch vs reference"

    # 3) bf16 MXU operands (f32 accumulation / bias / ReLU), default batch_tile
    #    -> 32-row tiles (multiple of 16 sublanes), 2 grid steps.
    out3 = jax.block_until_ready(behavior_cloning_forward(x2, prep_bf16))
    assert out3.shape == (64, action_dim)
    assert jnp.allclose(out3, ref2, atol=1e-1, rtol=1e-1), "bf16 mismatch vs reference"

    print("KERNEL_OK")
</pallas_src>

<mosaic_0001>
module attributes {stable_mosaic.version = 11 : i64} {
  func.func @_mlp_kernel(%arg0: i32, %arg1: memref<8x16xf32, #tpu.memory_space<vmem>>, %arg2: memref<16x128xf32, #tpu.memory_space<vmem>>, %arg3: memref<128x128xf32, #tpu.memory_space<vmem>>, %arg4: memref<128x8xf32, #tpu.memory_space<vmem>>, %arg5: memref<2x128xf32, #tpu.memory_space<vmem>>, %arg6: memref<1x8xf32, #tpu.memory_space<vmem>>, %arg7: memref<8x8xf32, #tpu.memory_space<vmem>>) attributes {dimension_semantics = [#tpu.dimension_semantics<parallel>], iteration_bounds = array<i64: 1>, scalar_prefetch = 0 : i64, scratch_operands = 0 : i64, tpu.core_type = #tpu.core_type<tc>, window_params = [{transform_indices = @transform_0, window_bounds = array<i64: 8, 16>}, {pipeline_mode = #tpu.pipeline_mode<synchronous>, transform_indices = @transform_1, window_bounds = array<i64: 16, 128>}, {pipeline_mode = #tpu.pipeline_mode<synchronous>, transform_indices = @transform_2, window_bounds = array<i64: 128, 128>}, {pipeline_mode = #tpu.pipeline_mode<synchronous>, transform_indices = @transform_3, window_bounds = array<i64: 128, 8>}, {pipeline_mode = #tpu.pipeline_mode<synchronous>, transform_indices = @transform_4, window_bounds = array<i64: 2, 128>}, {pipeline_mode = #tpu.pipeline_mode<synchronous>, transform_indices = @transform_5, window_bounds = array<i64: 1, 8>}, {transform_indices = @transform_6, window_bounds = array<i64: 8, 8>}]} {
    %c0 = arith.constant 0 : index
    %c0_0 = arith.constant 0 : index
    %0 = vector.load %arg1[%c0, %c0_0] : memref<8x16xf32, #tpu.memory_space<vmem>>, vector<8x16xf32>
    %c0_1 = arith.constant 0 : index
    %c0_2 = arith.constant 0 : index
    %1 = vector.load %arg2[%c0_1, %c0_2] : memref<16x128xf32, #tpu.memory_space<vmem>>, vector<16x128xf32>
    %cst = arith.constant dense<0.000000e+00> : vector<8x128xf32>
    %2 = tpu.matmul %0, %1, %cst {dimension_numbers = #tpu.dot_dimension_numbers<[1], [0], [0], [1], [0, 0, 1, 1], [], []>} : vector<8x16xf32>, vector<16x128xf32>, vector<8x128xf32> -> vector<8x128xf32>
    %c0_3 = arith.constant 0 : index
    %c0_4 = arith.constant 0 : index
    %3 = vector.load %arg5[%c0_3, %c0_4] : memref<2x128xf32, #tpu.memory_space<vmem>>, vector<1x128xf32>
    %4 = vector.broadcast %3 : vector<1x128xf32> to vector<8x128xf32>
    %5 = arith.addf %2, %4 : vector<8x128xf32>
    %cst_5 = arith.constant 0.000000e+00 : f32
    %6 = vector.broadcast %cst_5 : f32 to vector<8x128xf32>
    %7 = arith.maximumf %5, %6 : vector<8x128xf32>
    %c0_6 = arith.constant 0 : index
    %c0_7 = arith.constant 0 : index
    %8 = vector.load %arg3[%c0_6, %c0_7] : memref<128x128xf32, #tpu.memory_space<vmem>>, vector<128x128xf32>
    %cst_8 = arith.constant dense<0.000000e+00> : vector<8x128xf32>
    %9 = tpu.matmul %7, %8, %cst_8 {dimension_numbers = #tpu.dot_dimension_numbers<[1], [0], [0], [1], [0, 0, 1, 1], [], []>} : vector<8x128xf32>, vector<128x128xf32>, vector<8x128xf32> -> vector<8x128xf32>
    %c1 = arith.constant 1 : index
    %c0_9 = arith.constant 0 : index
    %10 = vector.load %arg5[%c1, %c0_9] : memref<2x128xf32, #tpu.memory_space<vmem>>, vector<1x128xf32>
    %11 = vector.broadcast %10 : vector<1x128xf32> to vector<8x128xf32>
    %12 = arith.addf %9, %11 : vector<8x128xf32>
    %cst_10 = arith.constant 0.000000e+00 : f32
    %13 = vector.broadcast %cst_10 : f32 to vector<8x128xf32>
    %14 = arith.maximumf %12, %13 : vector<8x128xf32>
    %c0_11 = arith.constant 0 : index
    %c0_12 = arith.constant 0 : index
    %15 = vector.load %arg4[%c0_11, %c0_12] : memref<128x8xf32, #tpu.memory_space<vmem>>, vector<128x8xf32>
    %cst_13 = arith.constant dense<0.000000e+00> : vector<8x8xf32>
    %16 = tpu.matmul %14, %15, %cst_13 {dimension_numbers = #tpu.dot_dimension_numbers<[1], [0], [0], [1], [0, 0, 1, 1], [], []>} : vector<8x128xf32>, vector<128x8xf32>, vector<8x8xf32> -> vector<8x8xf32>
    %c0_14 = arith.constant 0 : index
    %c0_15 = arith.constant 0 : index
    %17 = vector.load %arg6[%c0_14, %c0_15] : memref<1x8xf32, #tpu.memory_space<vmem>>, vector<1x8xf32>
    %18 = vector.broadcast %17 : vector<1x8xf32> to vector<8x8xf32>
    %19 = arith.addf %16, %18 : vector<8x8xf32>
    %c0_16 = arith.constant 0 : index
    %c0_17 = arith.constant 0 : index
    %20 = vector.load %arg7[%c0_16, %c0_17] : memref<8x8xf32, #tpu.memory_space<vmem>>, vector<8x8xf32>
    tpu.vector_store %arg7[%c0_16, %c0_17], %19 {strides = array<i32>} : memref<8x8xf32, #tpu.memory_space<vmem>>, vector<8x8xf32>,
    return
  }
  func.func @transform_0(%arg0: i32) -> (i32, i32) {
    %c0_i32 = arith.constant 0 : i32
    %c0_i32_0 = arith.constant 0 : i32
    return %arg0, %c0_i32 : i32, i32
  }
  func.func @transform_1(%arg0: i32) -> (i32, i32) {
    %c0_i32 = arith.constant 0 : i32
    %c0_i32_0 = arith.constant 0 : i32
    %c0_i32_1 = arith.constant 0 : i32
    return %c0_i32, %c0_i32_0 : i32, i32
  }
  func.func @transform_2(%arg0: i32) -> (i32, i32) {
    %c0_i32 = arith.constant 0 : i32
    %c0_i32_0 = arith.constant 0 : i32
    %c0_i32_1 = arith.constant 0 : i32
    return %c0_i32, %c0_i32_0 : i32, i32
  }
  func.func @transform_3(%arg0: i32) -> (i32, i32) {
    %c0_i32 = arith.constant 0 : i32
    %c0_i32_0 = arith.constant 0 : i32
    %c0_i32_1 = arith.constant 0 : i32
    return %c0_i32, %c0_i32_0 : i32, i32
  }
  func.func @transform_4(%arg0: i32) -> (i32, i32) {
    %c0_i32 = arith.constant 0 : i32
    %c0_i32_0 = arith.constant 0 : i32
    %c0_i32_1 = arith.constant 0 : i32
    return %c0_i32, %c0_i32_0 : i32, i32
  }
  func.func @transform_5(%arg0: i32) -> (i32, i32) {
    %c0_i32 = arith.constant 0 : i32
    %c0_i32_0 = arith.constant 0 : i32
    %c0_i32_1 = arith.constant 0 : i32
    return %c0_i32, %c0_i32_0 : i32, i32
  }
  func.func @transform_6(%arg0: i32) -> (i32, i32) {
    %c0_i32 = arith.constant 0 : i32
    %c0_i32_0 = arith.constant 0 : i32
    return %arg0, %c0_i32 : i32, i32
  }
}

</mosaic_0001>

<bundles_post_ra>
// kernel: tpu_custom_call.1
= control target key start
LH: loop header
LB: loop body
LE: loop exit
PB: predicated region body
PF: predicated region fallthrough
CT: control target
= control target key end

     0   :  { %11 = vsyncpa [#allocation3], 0  ;;  %s686_s0 = inlined_call_operand.vmem [shape: f32[8,16], index: 0, kind: input, shape index: {}]   ;;  %s687_s1 = inlined_call_operand.hbm [shape: f32[16,128], index: 1, kind: input, shape index: {}]   ;;  %s688_s2 = inlined_call_operand.vmem [shape: f32[128,128], index: 2, kind: input, shape index: {}]   ;;  %s689_s3 = inlined_call_operand.vmem [shape: f32[128,8], index: 3, kind: input, shape index: {}]   ;;  %s690_s4 = inlined_call_operand.vmem [shape: f32[2,128], index: 4, kind: input, shape index: {}]   ;;  %s691_s5 = inlined_call_operand.vmem [shape: f32[1,8], index: 5, kind: input, shape index: {}]   ;;  %s692_s6 = inlined_call_operand.hbm [shape: f32[8,8], index: 6, kind: output, shape index: {}]  }
   0x1   :  { %12 = vsyncpa [#allocation4], 0  ;;  %s491_s21 = smov [#allocation2]  }
   0x2   :  { %s20_s22 = sshll.u32 %s491_s21, 4  ;;  %s21_s22 = int_to_ptr.vmem [resolvable:$true] %s20_s22 }
   0x3   :  { %s455_s23 = scalar_lea.vmem %s21_s22, 256  ;;  %p460_p1 = scmp.lt.s32.totalorder %s21_s22, %s21_s22 }
   0x4   :  { %p456_p0 = scmp.ne.s32.totalorder %s21_s22, %s455_s23  ;;  %p461_p2 = scmp.lt.s32.totalorder %s455_s23, %s455_s23 }
   0x6   :  { %p462_p3 = por %p461_p2, %p460_p1 }
   0x8   :  { %p463_p4 = pnand %p462_p3, %p456_p0 }
   0xa   :  { %466 = shalt.err (!%p463_p4)
}
   0xb   :  { %s492_s24 = smov 128   ;;  %s493_s25 = smov 8  }
   0xc   :  { %26 = dma.hbm_to_vmem [thread:$0]  %s687_s1, 256, %s21_s22, [#allocation3], %s492_s24, %s492_s24, %s493_s25  }
   0xd   :  { %487 = dma.done.wait [#allocation3], 256  }
   0xe   :  { %488 = vsyncadd [#allocation3], 4294967040  ;;  %v494_v0 = vmov 0.0   ;;  %vm495_vm0 = vmmov 0   ;;  %v40_v1 = vld [vmem:[#allocation2 + $0x8] sm:$0xff]  ;;  %v39_v2 = vld [vmem:[#allocation2] sm:$0xff] }
   0xf   :  { %364 = vmatprep.subr.mxu0 %v494_v0  ;;  %368 = vmatprep.mubr.msk.f32.mxu0 %vm495_vm0, %v494_v0  ;;  %v38_v3 = vld [vmem:[%s686_s0] sm:$0xff]  ;;  %vm46_vm1 = vcmask 130048   ;;  %v136_v4 = vld [vmem:[%s688_s2 + $0x78] sm:$0xff]  ;;  %v135_v5 = vld [vmem:[%s688_s2 + $0x70] sm:$0xff]  ;;  %s496_s20 = smov [#allocation5]   ;;  %vm306_vm2 = vcmask 64512  }
  0x10   :  { %371 = vmatprep.subr.mxu1 %v494_v0  ;;  %403 = vmatprep.mubr.msk.f32.mxu1 %vm495_vm0, %v494_v0  ;;  %v134_v6 = vld [vmem:[%s688_s2 + $0x68] sm:$0xff]  ;;  %v133_v7 = vld [vmem:[%s688_s2 + $0x60] sm:$0xff]  ;;  %v132_v8 = vld [vmem:[%s688_s2 + $0x58] sm:$0xff]  ;;  %s314_s21 = sshll.u32 %s496_s20, 4  ;;  %s315_s21 = int_to_ptr.vmem [resolvable:$true] %s314_s21 }
  0x11   :  { %365 = vmatpush3.msra.mxu0 %v40_v1  ;;  %372 = vmatpush3.msra.mxu1 %v136_v4  ;;  %v131_v9 = vld [vmem:[%s688_s2 + $0x50] sm:$0xff]  ;;  %v130_v10 = vld [vmem:[%s688_s2 + $0x48] sm:$0xff]  ;;  %v129_v11 = vld [vmem:[%s688_s2 + $0x40] sm:$0xff]  ;;  %p472_p6 = scmp.lt.s32.totalorder %s315_s21, %s315_s21 }
  0x12   :  { %366 = vmatprep.subr.mxu0 %v494_v0  ;;  %373 = vmatprep.subr.mxu1 %v494_v0  ;;  %v128_v12 = vld [vmem:[%s688_s2 + $0x38] sm:$0xff]  ;;  %v127_v13 = vld [vmem:[%s688_s2 + $0x30] sm:$0xff]  ;;  %v126_v14 = vld [vmem:[%s688_s2 + $0x28] sm:$0xff] }
  0x13   :  { %367 = vmatpush3.msra.mxu0 %v39_v2  ;;  %374 = vmatpush3.msra.mxu1 %v135_v5  ;;  %v125_v15 = vld [vmem:[%s688_s2 + $0x20] sm:$0xff]  ;;  %v124_v16 = vld [vmem:[%s688_s2 + $0x18] sm:$0xff]  ;;  %v123_v17 = vld [vmem:[%s688_s2 + $0x10] sm:$0xff] }
  0x14   :  { %369 = vmatmul.mubr.msk.f32.vlgmr.msra.gmra.mxu0 %vm46_vm1, %v38_v3  ;;  %375 = vmatprep.subr.mxu1 %v494_v0  ;;  %v122_v18 = vld [vmem:[%s688_s2 + $0x8] sm:$0xff]  ;;  %v121_v19 = vld [vmem:[%s688_s2] sm:$0xff]  ;;  %v228_v20 = vld [vmem:[%s689_s3 + $0x78] sm:$0xff] }
  0x15   :  { %406 = vmatprep.subr.mxu0 %v494_v0  ;;  %376 = vmatpush3.msra.mxu1 %v134_v6  ;;  %v227_v21 = vld [vmem:[%s689_s3 + $0x70] sm:$0xff]  ;;  %v226_v22 = vld [vmem:[%s689_s3 + $0x68] sm:$0xff]  ;;  %v225_v23 = vld [vmem:[%s689_s3 + $0x60] sm:$0xff] }
  0x16   :  { %438 = vmatprep.mubr.msk.f32.mxu0 %vm495_vm0, %v494_v0  ;;  %377 = vmatprep.subr.mxu1 %v494_v0  ;;  %v224_v24 = vld [vmem:[%s689_s3 + $0x58] sm:$0xff]  ;;  %v223_v25 = vld [vmem:[%s689_s3 + $0x50] sm:$0xff]  ;;  %v222_v26 = vld [vmem:[%s689_s3 + $0x48] sm:$0xff] }
  0x17   :  { %378 = vmatpush3.msra.mxu1 %v133_v7  ;;  %407 = vmatpush3.msra.mxu0 %v228_v20  ;;  %v221_v27 = vld [vmem:[%s689_s3 + $0x40] sm:$0xff]  ;;  %v220_v28 = vld [vmem:[%s689_s3 + $0x38] sm:$0xff]  ;;  %v219_v29 = vld [vmem:[%s689_s3 + $0x30] sm:$0xff] }
  0x18   :  { %379 = vmatprep.subr.mxu1 %v494_v0  ;;  %408 = vmatprep.subr.mxu0 %v494_v0  ;;  %v218_v30 = vld [vmem:[%s689_s3 + $0x28] sm:$0xff]  ;;  %v217_v31 = vld [vmem:[%s689_s3 + $0x20] sm:$0xff]  ;;  %v216_v32 = vld [vmem:[%s689_s3 + $0x18] sm:$0xff] }
  0x19   :  { %380 = vmatpush3.msra.mxu1 %v132_v8  ;;  %409 = vmatpush3.msra.mxu0 %v227_v21  ;;  %v323_v33 = vld [vmem:[%s690_s4] ss:$0 sm:$0xff]  ;;  %v215_v38 = vld [vmem:[%s689_s3 + $0x10] sm:$0xff]  ;;  %v214_v39 = vld [vmem:[%s689_s3 + $0x8] sm:$0xff] }
  0x1a   :  { %381 = vmatprep.subr.mxu1 %v494_v0  ;;  %410 = vmatprep.subr.mxu0 %v494_v0  ;;  %v213_v40 = vld [vmem:[%s689_s3] sm:$0xff]  ;;  %s467_s3 = scalar_lea.vmem %s315_s21, 128 }
  0x1b   :  { %382 = vmatpush3.msra.mxu1 %v131_v9  ;;  %411 = vmatpush3.msra.mxu0 %v226_v22  ;;  %v325_v41 = vld [vmem:[%s690_s4 + $0x1] ss:$0 sm:$0xff]  ;;  %v326_v46 = vld [vmem:[%s691_s5] ss:$0 sm:$0xff]  ;;  %p468_p5 = scmp.ne.s32.totalorder %s315_s21, %s467_s3  ;;  %p473_p7 = scmp.lt.s32.totalorder %s467_s3, %s467_s3 }
  0x1c   :  { %383 = vmatprep.subr.mxu1 %v494_v0  ;;  %412 = vmatprep.subr.mxu0 %v494_v0 }
  0x1d   :  { %384 = vmatpush3.msra.mxu1 %v130_v10  ;;  %413 = vmatpush3.msra.mxu0 %v225_v23  ;;  %p474_p8 = por %p473_p7, %p472_p6 }
  0x1e   :  { %385 = vmatprep.subr.mxu1 %v494_v0  ;;  %414 = vmatprep.subr.mxu0 %v494_v0 }
  0x1f   :  { %386 = vmatpush3.msra.mxu1 %v129_v11  ;;  %415 = vmatpush3.msra.mxu0 %v224_v24  ;;  %p475_p9 = pnand %p474_p8, %p468_p5 }
  0x20   :  { %387 = vmatprep.subr.mxu1 %v494_v0  ;;  %416 = vmatprep.subr.mxu0 %v494_v0 }
  0x21   :  { %388 = vmatpush3.msra.mxu1 %v128_v12  ;;  %417 = vmatpush3.msra.mxu0 %v223_v25 }
  0x22   :  { %389 = vmatprep.subr.mxu1 %v494_v0  ;;  %418 = vmatprep.subr.mxu0 %v494_v0 }
  0x23   :  { %390 = vmatpush3.msra.mxu1 %v127_v13  ;;  %419 = vmatpush3.msra.mxu0 %v222_v26 }
  0x24   :  { %391 = vmatprep.subr.mxu1 %v494_v0  ;;  %420 = vmatprep.subr.mxu0 %v494_v0 }
  0x25   :  { %392 = vmatpush3.msra.mxu1 %v126_v14  ;;  %421 = vmatpush3.msra.mxu0 %v221_v27 }
  0x26   :  { %393 = vmatprep.subr.mxu1 %v494_v0  ;;  %422 = vmatprep.subr.mxu0 %v494_v0 }
  0x27   :  { %394 = vmatpush3.msra.mxu1 %v125_v15  ;;  %423 = vmatpush3.msra.mxu0 %v220_v28 }
  0x28   :  { %395 = vmatprep.subr.mxu1 %v494_v0  ;;  %424 = vmatprep.subr.mxu0 %v494_v0 }
  0x29   :  { %396 = vmatpush3.msra.mxu1 %v124_v16  ;;  %425 = vmatpush3.msra.mxu0 %v219_v29 }
  0x2a   :  { %397 = vmatprep.subr.mxu1 %v494_v0  ;;  %426 = vmatprep.subr.mxu0 %v494_v0 }
  0x2b   :  { %398 = vmatpush3.msra.mxu1 %v123_v17  ;;  %427 = vmatpush3.msra.mxu0 %v218_v30 }
  0x2c   :  { %399 = vmatprep.subr.mxu1 %v494_v0  ;;  %428 = vmatprep.subr.mxu0 %v494_v0 }
  0x2d   :  { %400 = vmatpush3.msra.mxu1 %v122_v18  ;;  %429 = vmatpush3.msra.mxu0 %v217_v31 }
  0x2e   :  { %401 = vmatprep.subr.mxu1 %v494_v0  ;;  %430 = vmatprep.subr.mxu0 %v494_v0 }
  0x2f   :  { %402 = vmatpush3.msra.mxu1 %v121_v19  ;;  %431 = vmatpush3.msra.mxu0 %v216_v32 }
  0x30   :  { %432 = vmatprep.subr.mxu0 %v494_v0 }
  0x31   :  { %433 = vmatpush3.msra.mxu0 %v215_v38 }
  0x32   :  { %434 = vmatprep.subr.mxu0 %v494_v0 }
  0x33   :  { %435 = vmatpush3.msra.mxu0 %v214_v39 }
  0x34   :  { %436 = vmatprep.subr.mxu0 %v494_v0 }
  0x35   :  { %437 = vmatpush3.msra.mxu0 %v213_v40 }
  0xd4   :  { %v116_v34 = vpop.f32.mrf.mxu0 }
  0xd5   :  { %v117_v35 = vadd.f32 %v323_v33, %v116_v34 }
  0xd6   :  { %v370_v36 = vpop.f32.mrf.mxu0 }
  0xd7   :  { %v120_v37 = vmax.f32 %v117_v35, 0.0 }
  0xd9   :  { %404 = vmatmul.mubr.f32.vlgmr.msra.gmra.mxu1 %v120_v37 }
 0x199   :  { %v208_v42 = vpop.f32.mrf.mxu1 }
 0x19a   :  { %v209_v43 = vadd.f32 %v325_v41, %v208_v42 }
 0x19b   :  { %v405_v44 = vpop.f32.mrf.mxu1 }
 0x19c   :  { %v212_v45 = vmax.f32 %v209_v43, 0.0 }
 0x19e   :  { %439 = vmatmul.mubr.f32.vlgmr.msra.gmra.mxu0 %v212_v45 }
 0x25e   :  { %v302_v47 = vpop.f32.mrf.mxu0 }
 0x25f   :  { %v303_v48 = vadd.f32 %v326_v46, %v302_v47 }
 0x260   :  { %v440_v49 = vpop.f32.mrf.mxu0 }
 0x261   :  { %307 = vst.msk [vmem:[#allocation5] sm:$0xff] %vm306_vm2, %v303_v48 }
 0x262   :  { %478 = shalt.err (!%p475_p9)
}
 0x263   :  { %317 = dma.vmem_to_hbm [thread:$0]  %s315_s21, 128, %s692_s6, [#allocation4]  }
 0x264   :  { %489 = dma.done.wait [#allocation4], 128  }
 0x265   :  { %490 = vsyncadd [#allocation4], 4294967168 }
 0x266   :  { %321 = vsyncpa [#allocation3], 1 }
 0x267   :  { %322 = vsyncpa [#allocation4], 1 }

</bundles_post_ra>
